<compile_context>
chip_gen: v7x
topology: tpu7x:2x2x1
jax: 0.10.0
libtpu: 0.0.40
codegen_flags: <defaults>
</compile_context>

<pallas_src>
import functools

import numpy as np
import jax
import jax.numpy as jnp
from jax.experimental import pallas as pl
from jax.experimental.pallas import tpu as pltpu


# ----------------------------------------------------------------------------------
# Bilinear (align_corners=True) interpolation matrices, built on host as constants.
# ----------------------------------------------------------------------------------
def bilinear_matrix_align_corners(out_size, in_size):
    if out_size == 1 or in_size == 1:
        R = np.zeros((out_size, in_size), np.float32)
        R[:, 0] = 1.0
        return R
    src = np.arange(out_size, dtype=np.float64) * (in_size - 1) / (out_size - 1)
    lo = np.clip(np.floor(src).astype(np.int64), 0, in_size - 1)
    hi = np.clip(lo + 1, 0, in_size - 1)
    frac = (src - lo).astype(np.float32)
    R = np.zeros((out_size, in_size), np.float32)
    R[np.arange(out_size), lo] += (1.0 - frac)
    R[np.arange(out_size), hi] += frac
    return R


# ----------------------------------------------------------------------------------
# Kernel 1: fused branch
#   (1x1 conv [BN scale folded] + bias + ReLU) -> (3x3 depthwise [BN scale folded]
#   + bias + ReLU) -> (projection onto the gather output channels [gather BN folded])
# All intermediates stay in VMEM; padding for the depthwise conv is done in a scratch.
# ----------------------------------------------------------------------------------
def _branch_kernel(x_ref, wpw_ref, bpw_ref, wdw_ref, bdw_ref, wproj_ref,
                   o_ref, pad_ref, *, H, W):
    C = wpw_ref.shape[1]

    # 1x1 conv over all pixels of this image as one MXU matmul.
    y = jnp.dot(x_ref[0], wpw_ref[...], preferred_element_type=jnp.float32)
    y = jnp.maximum(y + bpw_ref[...], 0.0)                       # (H*W, C)

    # Zero-padded copy in VMEM scratch. Interior starts at sublane offset 8 so the
    # store is tile-aligned; one zero column of halo sits on each side of it.
    pad_ref[...] = jnp.zeros_like(pad_ref)
    pad_ref[pl.ds(1, H), pl.ds(8, W), :] = y.reshape(H, W, C)
    xp = pad_ref[...]                                            # (H+2, W+16, C)

    # 3x3 depthwise conv (groups == channels), BN scale already folded into wdw.
    acc = jnp.zeros((H, W, C), jnp.float32)
    for dy in range(3):
        for dx in range(3):
            acc = acc + xp[dy:dy + H, dx + 7:dx + 7 + W, :] * wdw_ref[dy * 3 + dx, :]
    z = jnp.maximum(acc + bdw_ref[0], 0.0)                       # (H, W, C)

    # Project straight onto the gather output channels so the wide mid-channel
    # activation never round-trips HBM (replaces the concat + gather 1x1 conv).
    o_ref[0] = jnp.dot(z.reshape(H * W, C), wproj_ref[...],
                       preferred_element_type=jnp.float32).astype(o_ref.dtype)


def fused_branch(x2d, H, W, wpw, bpw, wdw, bdw, wproj):
    # x2d: (N, H*W, Cin) pixels-on-rows; returns (N, H*W, Cout) gather contribution.
    N, HW, Cin = x2d.shape
    Cmid = wpw.shape[1]
    Cout = wproj.shape[1]
    flops = int(N * HW * (2 * Cin * Cmid + 18 * Cmid + 2 * Cmid * Cout))
    bytes_accessed = int(4 * (x2d.size + N * HW * Cout + wpw.size + bpw.size
                              + wdw.size + bdw.size + wproj.size))
    return pl.pallas_call(
        functools.partial(_branch_kernel, H=H, W=W),
        out_shape=jax.ShapeDtypeStruct((N, HW, Cout), jnp.float32),
        grid=(N,),
        in_specs=[
            pl.BlockSpec((1, HW, Cin), lambda b: (b, 0, 0)),
            pl.BlockSpec((Cin, Cmid), lambda b: (0, 0)),
            pl.BlockSpec((1, Cmid), lambda b: (0, 0)),
            pl.BlockSpec((9, Cmid), lambda b: (0, 0)),
            pl.BlockSpec((1, Cmid), lambda b: (0, 0)),
            pl.BlockSpec((Cmid, Cout), lambda b: (0, 0)),
        ],
        out_specs=pl.BlockSpec((1, HW, Cout), lambda b: (b, 0, 0)),
        scratch_shapes=[pltpu.VMEM((H + 2, W + 16, Cmid), jnp.float32)],
        compiler_params=pltpu.CompilerParams(
            dimension_semantics=("parallel",),
            vmem_limit_bytes=32 * 1024 * 1024),
        cost_estimate=pl.CostEstimate(flops=flops, transcendentals=0,
                                      bytes_accessed=bytes_accessed),
    )(x2d, wpw, bpw, wdw, bdw, wproj)


# ----------------------------------------------------------------------------------
# Kernel 2: fused bilinear resize (align_corners=True) of the high contribution
#           + low contribution + gather bias.  Both resize passes are plain 2D
#           matmuls on a lane-dense (rows, W*Cout) slab; output is lane-dense too.
# ----------------------------------------------------------------------------------
def _combine_kernel(gl_ref, gh_ref, rh_ref, rwe_ref, bias_ref, o_ref):
    u = jnp.dot(rh_ref[...], gh_ref[0], preferred_element_type=jnp.float32)   # (Hl, Wh*Co)
    v = jnp.dot(u, rwe_ref[...], preferred_element_type=jnp.float32)          # (Hl, Wl*Co)
    o_ref[0] = (gl_ref[0] + v + bias_ref[...]).astype(o_ref.dtype)


def fused_resize_gather(gl2, gh2, Rh, RwExp, bias_row):
    N, Hl, WlC = gl2.shape
    _, Hh, WhC = gh2.shape
    flops = int(N * (2 * Hl * Hh * WhC + 2 * Hl * WhC * WlC))
    bytes_accessed = int(4 * (gl2.size + gh2.size + Rh.size + RwExp.size
                              + bias_row.size + N * Hl * WlC))
    return pl.pallas_call(
        _combine_kernel,
        out_shape=jax.ShapeDtypeStruct((N, Hl, WlC), jnp.float32),
        grid=(N,),
        in_specs=[
            pl.BlockSpec((1, Hl, WlC), lambda b: (b, 0, 0)),
            pl.BlockSpec((1, Hh, WhC), lambda b: (b, 0, 0)),
            pl.BlockSpec((Hl, Hh), lambda b: (0, 0)),
            pl.BlockSpec((WhC, WlC), lambda b: (0, 0)),
            pl.BlockSpec((1, WlC), lambda b: (0, 0)),
        ],
        out_specs=pl.BlockSpec((1, Hl, WlC), lambda b: (b, 0, 0)),
        compiler_params=pltpu.CompilerParams(
            dimension_semantics=("parallel",),
            vmem_limit_bytes=32 * 1024 * 1024),
        cost_estimate=pl.CostEstimate(flops=flops, transcendentals=0,
                                      bytes_accessed=bytes_accessed),
    )(gl2, gh2, Rh, RwExp, bias_row)


# ----------------------------------------------------------------------------------
# Parameters (deterministic synthetic init) and BN folding (eval mode).
# ----------------------------------------------------------------------------------
def fold_bn(gamma, beta, mean, var, eps=1e-5):
    scale = gamma / jnp.sqrt(var + eps)
    bias = beta - mean * scale
    return scale, bias


def init_params(key, dim_high, dim_low, dim_out, expand_ratio=3):
    mid_h = dim_high * expand_ratio
    mid_l = dim_low * expand_ratio
    ks = jax.random.split(key, 10)

    def conv_w(k, cin, cout):  # 1x1 conv as (Cin, Cout)
        return jax.random.normal(k, (cin, cout), jnp.float32) * (1.0 / np.sqrt(cin))

    def dw_w(k, c):            # depthwise 3x3 as (9, C)
        return jax.random.normal(k, (9, c), jnp.float32) * (1.0 / 3.0)

    def bn(k, c):
        k1, k2, k3, k4 = jax.random.split(k, 4)
        gamma = 1.0 + 0.1 * jax.random.normal(k1, (c,), jnp.float32)
        beta = 0.1 * jax.random.normal(k2, (c,), jnp.float32)
        mean = 0.1 * jax.random.normal(k3, (c,), jnp.float32)
        var = 1.0 + 0.1 * jax.random.uniform(k4, (c,), jnp.float32)
        return fold_bn(gamma, beta, mean, var)

    return dict(
        prog_low_w=conv_w(ks[0], dim_low, mid_l),   prog_low_bn=bn(ks[1], mid_l),
        low_dw_w=dw_w(ks[2], mid_l),                low_dw_bn=bn(ks[3], mid_l),
        prog_high_w=conv_w(ks[4], dim_high, mid_h), prog_high_bn=bn(ks[5], mid_h),
        high_dw_w=dw_w(ks[6], mid_h),               high_dw_bn=bn(ks[7], mid_h),
        gather_w=conv_w(ks[8], mid_l + mid_h, dim_out), gather_bn=bn(ks[9], dim_out),
    )


# ----------------------------------------------------------------------------------
# Forward pass (matches RtHighFeatureFusion.forward, eval-mode BN).
# ----------------------------------------------------------------------------------
def rt_high_feature_fusion(params, low_nchw, high_nchw):
    N, Cl, Hl, Wl = low_nchw.shape
    _, Ch, Hh, Wh = high_nchw.shape
    mid_l = params["prog_low_w"].shape[1]
    dim_out = params["gather_w"].shape[1]

    # Fold BN scales into conv weights; keep only the biases for the kernels.
    s_pl, b_pl = params["prog_low_bn"]
    s_ph, b_ph = params["prog_high_bn"]
    s_ldw, b_ldw = params["low_dw_bn"]
    s_hdw, b_hdw = params["high_dw_bn"]
    s_g, b_g = params["gather_bn"]

    wpw_low = params["prog_low_w"] * s_pl[None, :]
    wpw_high = params["prog_high_w"] * s_ph[None, :]
    wdw_low = params["low_dw_w"] * s_ldw[None, :]
    wdw_high = params["high_dw_w"] * s_hdw[None, :]
    wg = params["gather_w"] * s_g[None, :]
    wproj_low = wg[:mid_l]      # channel order of torch.cat([low, high], dim=1)
    wproj_high = wg[mid_l:]

    # NCHW -> (N, H*W, C) pixels-on-rows layout (reshape after transpose is free).
    low2d = jnp.transpose(low_nchw, (0, 2, 3, 1)).reshape(N, Hl * Wl, Cl)
    high2d = jnp.transpose(high_nchw, (0, 2, 3, 1)).reshape(N, Hh * Wh, Ch)

    # Fused branch kernels -> per-branch gather contributions (N, H*W, dim_out).
    gl = fused_branch(low2d, Hl, Wl, wpw_low, b_pl.reshape(1, -1),
                      wdw_low, b_ldw.reshape(1, -1), wproj_low)
    gh = fused_branch(high2d, Hh, Wh, wpw_high, b_ph.reshape(1, -1),
                      wdw_high, b_hdw.reshape(1, -1), wproj_high)

    # Bilinear align_corners resize of the high contribution + combine + bias.
    Rh = jnp.asarray(bilinear_matrix_align_corners(Hl, Hh))
    Rw_np = bilinear_matrix_align_corners(Wl, Wh)
    # W-pass as one lane-space matmul with kron(Rw^T, I_Cout).
    # TODO(synk): for large Wl*dim_out replace the kron matrix with a per-column
    # two-tap combine (or a transposed second pass) to keep the constant small.
    RwExp = jnp.asarray(np.kron(Rw_np.T, np.eye(dim_out, dtype=np.float32)))
    bias_row = jnp.tile(b_g, Wl).reshape(1, Wl * dim_out)

    gl2 = gl.reshape(N, Hl, Wl * dim_out)   # free row-major relabels
    gh2 = gh.reshape(N, Hh, Wh * dim_out)
    out2 = fused_resize_gather(gl2, gh2, Rh, RwExp, bias_row)   # (N, Hl, Wl*dim_out)

    out = out2.reshape(N, Hl, Wl, dim_out)
    return jnp.transpose(out, (0, 3, 1, 2))    # back to NCHW


# ----------------------------------------------------------------------------------
# Pure-JAX reference in the ORIGINAL op order (pw->bn->relu, dw->bn->relu, resize,
# concat, gather->bn) to validate the algebraic refactoring inside the kernels.
# ----------------------------------------------------------------------------------
def _ref_forward(params, low_nchw, high_nchw):
    P = jax.lax.Precision.HIGHEST

    def pw(x, w, bn, relu):
        s, b = bn
        y = jnp.einsum('nhwc,co->nhwo', x, w, precision=P) * s + b
        return jnp.maximum(y, 0.0) if relu else y

    def dw(x, w9, bn):
        s, b = bn
        N, H, W, C = x.shape
        xp = jnp.pad(x, ((0, 0), (1, 1), (1, 1), (0, 0)))
        acc = jnp.zeros_like(x)
        for dy in range(3):
            for dx in range(3):
                acc = acc + xp[:, dy:dy + H, dx:dx + W, :] * w9[dy * 3 + dx]
        return jnp.maximum(acc * s + b, 0.0)

    def resize(x, oh, ow):
        Rh = jnp.asarray(bilinear_matrix_align_corners(oh, x.shape[1]))
        Rw = jnp.asarray(bilinear_matrix_align_corners(ow, x.shape[2]))
        y = jnp.einsum('ih,nhwc->niwc', Rh, x, precision=P)
        return jnp.einsum('jw,niwc->nijc', Rw, y, precision=P)

    low = jnp.transpose(low_nchw, (0, 2, 3, 1))
    high = jnp.transpose(high_nchw, (0, 2, 3, 1))
    low = pw(low, params["prog_low_w"], params["prog_low_bn"], True)
    low = dw(low, params["low_dw_w"], params["low_dw_bn"])
    high = pw(high, params["prog_high_w"], params["prog_high_bn"], True)
    high = dw(high, params["high_dw_w"], params["high_dw_bn"])
    high = resize(high, low.shape[1], low.shape[2])
    fea = jnp.concatenate([low, high], axis=-1)
    fea = pw(fea, params["gather_w"], params["gather_bn"], False)
    return jnp.transpose(fea, (0, 3, 1, 2))


if __name__ == "__main__":
    key = jax.random.PRNGKey(0)
    kp, kl, kh = jax.random.split(key, 3)

    dim_high, dim_low, dim_out = 8, 4, 16   # mid_high=24, mid_low=12
    params = init_params(kp, dim_high, dim_low, dim_out, expand_ratio=3)

    # "low" feature map: higher spatial res; "high" feature map: lower spatial res.
    low = jax.random.normal(kl, (2, dim_low, 16, 16), jnp.float32)
    high = jax.random.normal(kh, (2, dim_high, 8, 8), jnp.float32)

    fwd = jax.jit(rt_high_feature_fusion)
    out = fwd(params, low, high)
    out = jax.block_until_ready(out)

    assert out.shape == (2, dim_out, 16, 16), out.shape
    ref = _ref_forward(params, low, high)
    if not bool(jnp.allclose(out, ref, atol=2e-2, rtol=2e-2)):
        raise AssertionError("Pallas output does not match JAX reference")

    print("KERNEL_OK")
</pallas_src>

<mosaic_0001>
module attributes {stable_mosaic.version = 11 : i64} {
  func.func @_branch_kernel(%arg0: i32, %arg1: memref<1x64x8xf32, #tpu.memory_space<vmem>>, %arg2: memref<8x24xf32, #tpu.memory_space<vmem>>, %arg3: memref<1x24xf32, #tpu.memory_space<vmem>>, %arg4: memref<9x24xf32, #tpu.memory_space<vmem>>, %arg5: memref<1x24xf32, #tpu.memory_space<vmem>>, %arg6: memref<24x16xf32, #tpu.memory_space<vmem>>, %arg7: memref<1x64x16xf32, #tpu.memory_space<vmem>>, %arg8: memref<10x24x24xf32, #tpu.memory_space<vmem>>) attributes {dimension_semantics = [#tpu.dimension_semantics<parallel>], iteration_bounds = array<i64: 2>, scalar_prefetch = 0 : i64, scratch_operands = 1 : i64, tpu.core_type = #tpu.core_type<tc>, window_params = [{transform_indices = @transform_0, window_bounds = array<i64: 1, 64, 8>}, {pipeline_mode = #tpu.pipeline_mode<synchronous>, transform_indices = @transform_1, window_bounds = array<i64: 8, 24>}, {pipeline_mode = #tpu.pipeline_mode<synchronous>, transform_indices = @transform_2, window_bounds = array<i64: 1, 24>}, {pipeline_mode = #tpu.pipeline_mode<synchronous>, transform_indices = @transform_3, window_bounds = array<i64: 9, 24>}, {pipeline_mode = #tpu.pipeline_mode<synchronous>, transform_indices = @transform_4, window_bounds = array<i64: 1, 24>}, {pipeline_mode = #tpu.pipeline_mode<synchronous>, transform_indices = @transform_5, window_bounds = array<i64: 24, 16>}, {transform_indices = @transform_6, window_bounds = array<i64: 1, 64, 16>}]} {
    %c0 = arith.constant 0 : index
    %c0_0 = arith.constant 0 : index
    %c0_1 = arith.constant 0 : index
    %0 = vector.load %arg1[%c0, %c0_0, %c0_1] : memref<1x64x8xf32, #tpu.memory_space<vmem>>, vector<1x64x8xf32>
    %1 = vector.shape_cast %0 : vector<1x64x8xf32> to vector<64x8xf32>
    %c0_2 = arith.constant 0 : index
    %c0_3 = arith.constant 0 : index
    %2 = vector.load %arg2[%c0_2, %c0_3] : memref<8x24xf32, #tpu.memory_space<vmem>>, vector<8x24xf32>
    %cst = arith.constant dense<0.000000e+00> : vector<64x24xf32>
    %3 = tpu.matmul %1, %2, %cst {dimension_numbers = #tpu.dot_dimension_numbers<[1], [0], [0], [1], [0, 0, 1, 1], [], []>} : vector<64x8xf32>, vector<8x24xf32>, vector<64x24xf32> -> vector<64x24xf32>
    %c0_4 = arith.constant 0 : index
    %c0_5 = arith.constant 0 : index
    %4 = vector.load %arg3[%c0_4, %c0_5] : memref<1x24xf32, #tpu.memory_space<vmem>>, vector<1x24xf32>
    %5 = vector.broadcast %4 : vector<1x24xf32> to vector<64x24xf32>
    %6 = arith.addf %3, %5 : vector<64x24xf32>
    %cst_6 = arith.constant 0.000000e+00 : f32
    %7 = vector.broadcast %cst_6 : f32 to vector<64x24xf32>
    %8 = arith.maximumf %6, %7 : vector<64x24xf32>
    %cst_7 = arith.constant 0.000000e+00 : f32
    %9 = vector.broadcast %cst_7 : f32 to vector<10x24x24xf32>
    %c0_8 = arith.constant 0 : index
    %c0_9 = arith.constant 0 : index
    %c0_10 = arith.constant 0 : index
    %10 = vector.load %arg8[%c0_8, %c0_9, %c0_10] : memref<10x24x24xf32, #tpu.memory_space<vmem>>, vector<10x24x24xf32>
    tpu.vector_store %arg8[%c0_8, %c0_9, %c0_10], %9 {strides = array<i32>} : memref<10x24x24xf32, #tpu.memory_space<vmem>>, vector<10x24x24xf32>,
    %11 = vector.shape_cast %8 : vector<64x24xf32> to vector<8x8x24xf32>
    %c1 = arith.constant 1 : index
    %c8 = arith.constant 8 : index
    %c0_11 = arith.constant 0 : index
    %12 = vector.load %arg8[%c1, %c8, %c0_11] : memref<10x24x24xf32, #tpu.memory_space<vmem>>, vector<8x8x24xf32>
    tpu.vector_store %arg8[%c1, %c8, %c0_11], %11 {strides = array<i32>} : memref<10x24x24xf32, #tpu.memory_space<vmem>>, vector<8x8x24xf32>,
    %c0_12 = arith.constant 0 : index
    %c0_13 = arith.constant 0 : index
    %c0_14 = arith.constant 0 : index
    %13 = vector.load %arg8[%c0_12, %c0_13, %c0_14] : memref<10x24x24xf32, #tpu.memory_space<vmem>>, vector<10x24x24xf32>
    %cst_15 = arith.constant 0.000000e+00 : f32
    %14 = vector.broadcast %cst_15 : f32 to vector<8x8x24xf32>
    %15 = vector.extract_strided_slice %13 {offsets = [0, 7, 0], sizes = [8, 8, 24], strides = [1, 1, 1]} : vector<10x24x24xf32> to vector<8x8x24xf32>
    %c0_16 = arith.constant 0 : index
    %c0_17 = arith.constant 0 : index
    %16 = vector.load %arg4[%c0_16, %c0_17] : memref<9x24xf32, #tpu.memory_space<vmem>>, vector<1x24xf32>
    %17 = vector.shape_cast %16 : vector<1x24xf32> to vector<24xf32>
    %18 = vector.shape_cast %17 : vector<24xf32> to vector<1x1x24xf32>
    %19 = vector.broadcast %18 : vector<1x1x24xf32> to vector<8x8x24xf32>
    %20 = arith.mulf %15, %19 : vector<8x8x24xf32>
    %21 = arith.addf %14, %20 : vector<8x8x24xf32>
    %22 = vector.extract_strided_slice %13 {offsets = [0, 8, 0], sizes = [8, 8, 24], strides = [1, 1, 1]} : vector<10x24x24xf32> to vector<8x8x24xf32>
    %c1_18 = arith.constant 1 : index
    %c0_19 = arith.constant 0 : index
    %23 = vector.load %arg4[%c1_18, %c0_19] : memref<9x24xf32, #tpu.memory_space<vmem>>, vector<1x24xf32>
    %24 = vector.shape_cast %23 : vector<1x24xf32> to vector<24xf32>
    %25 = vector.shape_cast %24 : vector<24xf32> to vector<1x1x24xf32>
    %26 = vector.broadcast %25 : vector<1x1x24xf32> to vector<8x8x24xf32>
    %27 = arith.mulf %22, %26 : vector<8x8x24xf32>
    %28 = arith.addf %21, %27 : vector<8x8x24xf32>
    %29 = vector.extract_strided_slice %13 {offsets = [0, 9, 0], sizes = [8, 8, 24], strides = [1, 1, 1]} : vector<10x24x24xf32> to vector<8x8x24xf32>
    %c2 = arith.constant 2 : index
    %c0_20 = arith.constant 0 : index
    %30 = vector.load %arg4[%c2, %c0_20] : memref<9x24xf32, #tpu.memory_space<vmem>>, vector<1x24xf32>
    %31 = vector.shape_cast %30 : vector<1x24xf32> to vector<24xf32>
    %32 = vector.shape_cast %31 : vector<24xf32> to vector<1x1x24xf32>
    %33 = vector.broadcast %32 : vector<1x1x24xf32> to vector<8x8x24xf32>
    %34 = arith.mulf %29, %33 : vector<8x8x24xf32>
    %35 = arith.addf %28, %34 : vector<8x8x24xf32>
    %36 = vector.extract_strided_slice %13 {offsets = [1, 7, 0], sizes = [8, 8, 24], strides = [1, 1, 1]} : vector<10x24x24xf32> to vector<8x8x24xf32>
    %c3 = arith.constant 3 : index
    %c0_21 = arith.constant 0 : index
    %37 = vector.load %arg4[%c3, %c0_21] : memref<9x24xf32, #tpu.memory_space<vmem>>, vector<1x24xf32>
    %38 = vector.shape_cast %37 : vector<1x24xf32> to vector<24xf32>
    %39 = vector.shape_cast %38 : vector<24xf32> to vector<1x1x24xf32>
    %40 = vector.broadcast %39 : vector<1x1x24xf32> to vector<8x8x24xf32>
    %41 = arith.mulf %36, %40 : vector<8x8x24xf32>
    %42 = arith.addf %35, %41 : vector<8x8x24xf32>
    %43 = vector.extract_strided_slice %13 {offsets = [1, 8, 0], sizes = [8, 8, 24], strides = [1, 1, 1]} : vector<10x24x24xf32> to vector<8x8x24xf32>
    %c4 = arith.constant 4 : index
    %c0_22 = arith.constant 0 : index
    %44 = vector.load %arg4[%c4, %c0_22] : memref<9x24xf32, #tpu.memory_space<vmem>>, vector<1x24xf32>
    %45 = vector.shape_cast %44 : vector<1x24xf32> to vector<24xf32>
    %46 = vector.shape_cast %45 : vector<24xf32> to vector<1x1x24xf32>
    %47 = vector.broadcast %46 : vector<1x1x24xf32> to vector<8x8x24xf32>
    %48 = arith.mulf %43, %47 : vector<8x8x24xf32>
    %49 = arith.addf %42, %48 : vector<8x8x24xf32>
    %50 = vector.extract_strided_slice %13 {offsets = [1, 9, 0], sizes = [8, 8, 24], strides = [1, 1, 1]} : vector<10x24x24xf32> to vector<8x8x24xf32>
    %c5 = arith.constant 5 : index
    %c0_23 = arith.constant 0 : index
    %51 = vector.load %arg4[%c5, %c0_23] : memref<9x24xf32, #tpu.memory_space<vmem>>, vector<1x24xf32>
    %52 = vector.shape_cast %51 : vector<1x24xf32> to vector<24xf32>
    %53 = vector.shape_cast %52 : vector<24xf32> to vector<1x1x24xf32>
    %54 = vector.broadcast %53 : vector<1x1x24xf32> to vector<8x8x24xf32>
    %55 = arith.mulf %50, %54 : vector<8x8x24xf32>
    %56 = arith.addf %49, %55 : vector<8x8x24xf32>
    %57 = vector.extract_strided_slice %13 {offsets = [2, 7, 0], sizes = [8, 8, 24], strides = [1, 1, 1]} : vector<10x24x24xf32> to vector<8x8x24xf32>
    %c6 = arith.constant 6 : index
    %c0_24 = arith.constant 0 : index
    %58 = vector.load %arg4[%c6, %c0_24] : memref<9x24xf32, #tpu.memory_space<vmem>>, vector<1x24xf32>
    %59 = vector.shape_cast %58 : vector<1x24xf32> to vector<24xf32>
    %60 = vector.shape_cast %59 : vector<24xf32> to vector<1x1x24xf32>
    %61 = vector.broadcast %60 : vector<1x1x24xf32> to vector<8x8x24xf32>
    %62 = arith.mulf %57, %61 : vector<8x8x24xf32>
    %63 = arith.addf %56, %62 : vector<8x8x24xf32>
    %64 = vector.extract_strided_slice %13 {offsets = [2, 8, 0], sizes = [8, 8, 24], strides = [1, 1, 1]} : vector<10x24x24xf32> to vector<8x8x24xf32>
    %c7 = arith.constant 7 : index
    %c0_25 = arith.constant 0 : index
    %65 = vector.load %arg4[%c7, %c0_25] : memref<9x24xf32, #tpu.memory_space<vmem>>, vector<1x24xf32>
    %66 = vector.shape_cast %65 : vector<1x24xf32> to vector<24xf32>
    %67 = vector.shape_cast %66 : vector<24xf32> to vector<1x1x24xf32>
    %68 = vector.broadcast %67 : vector<1x1x24xf32> to vector<8x8x24xf32>
    %69 = arith.mulf %64, %68 : vector<8x8x24xf32>
    %70 = arith.addf %63, %69 : vector<8x8x24xf32>
    %71 = vector.extract_strided_slice %13 {offsets = [2, 9, 0], sizes = [8, 8, 24], strides = [1, 1, 1]} : vector<10x24x24xf32> to vector<8x8x24xf32>
    %c8_26 = arith.constant 8 : index
    %c0_27 = arith.constant 0 : index
    %72 = vector.load %arg4[%c8_26, %c0_27] : memref<9x24xf32, #tpu.memory_space<vmem>>, vector<1x24xf32>
    %73 = vector.shape_cast %72 : vector<1x24xf32> to vector<24xf32>
    %74 = vector.shape_cast %73 : vector<24xf32> to vector<1x1x24xf32>
    %75 = vector.broadcast %74 : vector<1x1x24xf32> to vector<8x8x24xf32>
    %76 = arith.mulf %71, %75 : vector<8x8x24xf32>
    %77 = arith.addf %70, %76 : vector<8x8x24xf32>
    %c0_28 = arith.constant 0 : index
    %c0_29 = arith.constant 0 : index
    %78 = vector.load %arg5[%c0_28, %c0_29] : memref<1x24xf32, #tpu.memory_space<vmem>>, vector<1x24xf32>
    %79 = vector.shape_cast %78 : vector<1x24xf32> to vector<24xf32>
    %80 = vector.shape_cast %79 : vector<24xf32> to vector<1x1x24xf32>
    %81 = vector.broadcast %80 : vector<1x1x24xf32> to vector<8x8x24xf32>
    %82 = arith.addf %77, %81 : vector<8x8x24xf32>
    %cst_30 = arith.constant 0.000000e+00 : f32
    %83 = vector.broadcast %cst_30 : f32 to vector<8x8x24xf32>
    %84 = arith.maximumf %82, %83 : vector<8x8x24xf32>
    %85 = vector.shape_cast %84 : vector<8x8x24xf32> to vector<64x24xf32>
    %c0_31 = arith.constant 0 : index
    %c0_32 = arith.constant 0 : index
    %86 = vector.load %arg6[%c0_31, %c0_32] : memref<24x16xf32, #tpu.memory_space<vmem>>, vector<24x16xf32>
    %cst_33 = arith.constant dense<0.000000e+00> : vector<64x16xf32>
    %87 = tpu.matmul %85, %86, %cst_33 {dimension_numbers = #tpu.dot_dimension_numbers<[1], [0], [0], [1], [0, 0, 1, 1], [], []>} : vector<64x24xf32>, vector<24x16xf32>, vector<64x16xf32> -> vector<64x16xf32>
    %c0_34 = arith.constant 0 : index
    %c0_35 = arith.constant 0 : index
    %c0_36 = arith.constant 0 : index
    %88 = vector.load %arg7[%c0_34, %c0_35, %c0_36] : memref<1x64x16xf32, #tpu.memory_space<vmem>>, vector<1x64x16xf32>
    %89 = vector.shape_cast %88 : vector<1x64x16xf32> to vector<64x16xf32>
    %90 = vector.shape_cast %87 : vector<64x16xf32> to vector<1x64x16xf32>
    tpu.vector_store %arg7[%c0_34, %c0_35, %c0_36], %90 {strides = array<i32>} : memref<1x64x16xf32, #tpu.memory_space<vmem>>, vector<1x64x16xf32>,
    return
  }
  func.func @transform_0(%arg0: i32) -> (i32, i32, i32) {
    %c0_i32 = arith.constant 0 : i32
    %c0_i32_0 = arith.constant 0 : i32
    %c0_i32_1 = arith.constant 0 : i32
    return %arg0, %c0_i32, %c0_i32_0 : i32, i32, i32
  }
  func.func @transform_1(%arg0: i32) -> (i32, i32) {
    %c0_i32 = arith.constant 0 : i32
    %c0_i32_0 = arith.constant 0 : i32
    %c0_i32_1 = arith.constant 0 : i32
    return %c0_i32, %c0_i32_0 : i32, i32
  }
  func.func @transform_2(%arg0: i32) -> (i32, i32) {
    %c0_i32 = arith.constant 0 : i32
    %c0_i32_0 = arith.constant 0 : i32
    %c0_i32_1 = arith.constant 0 : i32
    return %c0_i32, %c0_i32_0 : i32, i32
  }
  func.func @transform_3(%arg0: i32) -> (i32, i32) {
    %c0_i32 = arith.constant 0 : i32
    %c0_i32_0 = arith.constant 0 : i32
    %c0_i32_1 = arith.constant 0 : i32
    return %c0_i32, %c0_i32_0 : i32, i32
  }
  func.func @transform_4(%arg0: i32) -> (i32, i32) {
    %c0_i32 = arith.constant 0 : i32
    %c0_i32_0 = arith.constant 0 : i32
    %c0_i32_1 = arith.constant 0 : i32
    return %c0_i32, %c0_i32_0 : i32, i32
  }
  func.func @transform_5(%arg0: i32) -> (i32, i32) {
    %c0_i32 = arith.constant 0 : i32
    %c0_i32_0 = arith.constant 0 : i32
    %c0_i32_1 = arith.constant 0 : i32
    return %c0_i32, %c0_i32_0 : i32, i32
  }
  func.func @transform_6(%arg0: i32) -> (i32, i32, i32) {
    %c0_i32 = arith.constant 0 : i32
    %c0_i32_0 = arith.constant 0 : i32
    %c0_i32_1 = arith.constant 0 : i32
    return %arg0, %c0_i32, %c0_i32_0 : i32, i32, i32
  }
}

module attributes {stable_mosaic.version = 11 : i64} {
  func.func @_branch_kernel(%arg0: i32, %arg1: memref<1x256x4xf32, #tpu.memory_space<vmem>>, %arg2: memref<4x12xf32, #tpu.memory_space<vmem>>, %arg3: memref<1x12xf32, #tpu.memory_space<vmem>>, %arg4: memref<9x12xf32, #tpu.memory_space<vmem>>, %arg5: memref<1x12xf32, #tpu.memory_space<vmem>>, %arg6: memref<12x16xf32, #tpu.memory_space<vmem>>, %arg7: memref<1x256x16xf32, #tpu.memory_space<vmem>>, %arg8: memref<18x32x12xf32, #tpu.memory_space<vmem>>) attributes {dimension_semantics = [#tpu.dimension_semantics<parallel>], iteration_bounds = array<i64: 2>, scalar_prefetch = 0 : i64, scratch_operands = 1 : i64, tpu.core_type = #tpu.core_type<tc>, window_params = [{transform_indices = @transform_0, window_bounds = array<i64: 1, 256, 4>}, {pipeline_mode = #tpu.pipeline_mode<synchronous>, transform_indices = @transform_1, window_bounds = array<i64: 4, 12>}, {pipeline_mode = #tpu.pipeline_mode<synchronous>, transform_indices = @transform_2, window_bounds = array<i64: 1, 12>}, {pipeline_mode = #tpu.pipeline_mode<synchronous>, transform_indices = @transform_3, window_bounds = array<i64: 9, 12>}, {pipeline_mode = #tpu.pipeline_mode<synchronous>, transform_indices = @transform_4, window_bounds = array<i64: 1, 12>}, {pipeline_mode = #tpu.pipeline_mode<synchronous>, transform_indices = @transform_5, window_bounds = array<i64: 12, 16>}, {transform_indices = @transform_6, window_bounds = array<i64: 1, 256, 16>}]} {
    %c0 = arith.constant 0 : index
    %c0_0 = arith.constant 0 : index
    %c0_1 = arith.constant 0 : index
    %0 = vector.load %arg1[%c0, %c0_0, %c0_1] : memref<1x256x4xf32, #tpu.memory_space<vmem>>, vector<1x256x4xf32>
    %1 = vector.shape_cast %0 : vector<1x256x4xf32> to vector<256x4xf32>
    %c0_2 = arith.constant 0 : index
    %c0_3 = arith.constant 0 : index
    %2 = vector.load %arg2[%c0_2, %c0_3] : memref<4x12xf32, #tpu.memory_space<vmem>>, vector<4x12xf32>
    %cst = arith.constant dense<0.000000e+00> : vector<256x12xf32>
    %3 = tpu.matmul %1, %2, %cst {dimension_numbers = #tpu.dot_dimension_numbers<[1], [0], [0], [1], [0, 0, 1, 1], [], []>} : vector<256x4xf32>, vector<4x12xf32>, vector<256x12xf32> -> vector<256x12xf32>
    %c0_4 = arith.constant 0 : index
    %c0_5 = arith.constant 0 : index
    %4 = vector.load %arg3[%c0_4, %c0_5] : memref<1x12xf32, #tpu.memory_space<vmem>>, vector<1x12xf32>
    %5 = vector.broadcast %4 : vector<1x12xf32> to vector<256x12xf32>
    %6 = arith.addf %3, %5 : vector<256x12xf32>
    %cst_6 = arith.constant 0.000000e+00 : f32
    %7 = vector.broadcast %cst_6 : f32 to vector<256x12xf32>
    %8 = arith.maximumf %6, %7 : vector<256x12xf32>
    %cst_7 = arith.constant 0.000000e+00 : f32
    %9 = vector.broadcast %cst_7 : f32 to vector<18x32x12xf32>
    %c0_8 = arith.constant 0 : index
    %c0_9 = arith.constant 0 : index
    %c0_10 = arith.constant 0 : index
    %10 = vector.load %arg8[%c0_8, %c0_9, %c0_10] : memref<18x32x12xf32, #tpu.memory_space<vmem>>, vector<18x32x12xf32>
    tpu.vector_store %arg8[%c0_8, %c0_9, %c0_10], %9 {strides = array<i32>} : memref<18x32x12xf32, #tpu.memory_space<vmem>>, vector<18x32x12xf32>,
    %11 = vector.shape_cast %8 : vector<256x12xf32> to vector<16x16x12xf32>
    %c1 = arith.constant 1 : index
    %c8 = arith.constant 8 : index
    %c0_11 = arith.constant 0 : index
    %12 = vector.load %arg8[%c1, %c8, %c0_11] : memref<18x32x12xf32, #tpu.memory_space<vmem>>, vector<16x16x12xf32>
    tpu.vector_store %arg8[%c1, %c8, %c0_11], %11 {strides = array<i32>} : memref<18x32x12xf32, #tpu.memory_space<vmem>>, vector<16x16x12xf32>,
    %c0_12 = arith.constant 0 : index
    %c0_13 = arith.constant 0 : index
    %c0_14 = arith.constant 0 : index
    %13 = vector.load %arg8[%c0_12, %c0_13, %c0_14] : memref<18x32x12xf32, #tpu.memory_space<vmem>>, vector<18x32x12xf32>
    %cst_15 = arith.constant 0.000000e+00 : f32
    %14 = vector.broadcast %cst_15 : f32 to vector<16x16x12xf32>
    %15 = vector.extract_strided_slice %13 {offsets = [0, 7, 0], sizes = [16, 16, 12], strides = [1, 1, 1]} : vector<18x32x12xf32> to vector<16x16x12xf32>
    %c0_16 = arith.constant 0 : index
    %c0_17 = arith.constant 0 : index
    %16 = vector.load %arg4[%c0_16, %c0_17] : memref<9x12xf32, #tpu.memory_space<vmem>>, vector<1x12xf32>
    %17 = vector.shape_cast %16 : vector<1x12xf32> to vector<12xf32>
    %18 = vector.shape_cast %17 : vector<12xf32> to vector<1x1x12xf32>
    %19 = vector.broadcast %18 : vector<1x1x12xf32> to vector<16x16x12xf32>
    %20 = arith.mulf %15, %19 : vector<16x16x12xf32>
    %21 = arith.addf %14, %20 : vector<16x16x12xf32>
    %22 = vector.extract_strided_slice %13 {offsets = [0, 8, 0], sizes = [16, 16, 12], strides = [1, 1, 1]} : vector<18x32x12xf32> to vector<16x16x12xf32>
    %c1_18 = arith.constant 1 : index
    %c0_19 = arith.constant 0 : index
    %23 = vector.load %arg4[%c1_18, %c0_19] : memref<9x12xf32, #tpu.memory_space<vmem>>, vector<1x12xf32>
    %24 = vector.shape_cast %23 : vector<1x12xf32> to vector<12xf32>
    %25 = vector.shape_cast %24 : vector<12xf32> to vector<1x1x12xf32>
    %26 = vector.broadcast %25 : vector<1x1x12xf32> to vector<16x16x12xf32>
    %27 = arith.mulf %22, %26 : vector<16x16x12xf32>
    %28 = arith.addf %21, %27 : vector<16x16x12xf32>
    %29 = vector.extract_strided_slice %13 {offsets = [0, 9, 0], sizes = [16, 16, 12], strides = [1, 1, 1]} : vector<18x32x12xf32> to vector<16x16x12xf32>
    %c2 = arith.constant 2 : index
    %c0_20 = arith.constant 0 : index
    %30 = vector.load %arg4[%c2, %c0_20] : memref<9x12xf32, #tpu.memory_space<vmem>>, vector<1x12xf32>
    %31 = vector.shape_cast %30 : vector<1x12xf32> to vector<12xf32>
    %32 = vector.shape_cast %31 : vector<12xf32> to vector<1x1x12xf32>
    %33 = vector.broadcast %32 : vector<1x1x12xf32> to vector<16x16x12xf32>
    %34 = arith.mulf %29, %33 : vector<16x16x12xf32>
    %35 = arith.addf %28, %34 : vector<16x16x12xf32>
    %36 = vector.extract_strided_slice %13 {offsets = [1, 7, 0], sizes = [16, 16, 12], strides = [1, 1, 1]} : vector<18x32x12xf32> to vector<16x16x12xf32>
    %c3 = arith.constant 3 : index
    %c0_21 = arith.constant 0 : index
    %37 = vector.load %arg4[%c3, %c0_21] : memref<9x12xf32, #tpu.memory_space<vmem>>, vector<1x12xf32>
    %38 = vector.shape_cast %37 : vector<1x12xf32> to vector<12xf32>
    %39 = vector.shape_cast %38 : vector<12xf32> to vector<1x1x12xf32>
    %40 = vector.broadcast %39 : vector<1x1x12xf32> to vector<16x16x12xf32>
    %41 = arith.mulf %36, %40 : vector<16x16x12xf32>
    %42 = arith.addf %35, %41 : vector<16x16x12xf32>
    %43 = vector.extract_strided_slice %13 {offsets = [1, 8, 0], sizes = [16, 16, 12], strides = [1, 1, 1]} : vector<18x32x12xf32> to vector<16x16x12xf32>
    %c4 = arith.constant 4 : index
    %c0_22 = arith.constant 0 : index
    %44 = vector.load %arg4[%c4, %c0_22] : memref<9x12xf32, #tpu.memory_space<vmem>>, vector<1x12xf32>
    %45 = vector.shape_cast %44 : vector<1x12xf32> to vector<12xf32>
    %46 = vector.shape_cast %45 : vector<12xf32> to vector<1x1x12xf32>
    %47 = vector.broadcast %46 : vector<1x1x12xf32> to vector<16x16x12xf32>
    %48 = arith.mulf %43, %47 : vector<16x16x12xf32>
    %49 = arith.addf %42, %48 : vector<16x16x12xf32>
    %50 = vector.extract_strided_slice %13 {offsets = [1, 9, 0], sizes = [16, 16, 12], strides = [1, 1, 1]} : vector<18x32x12xf32> to vector<16x16x12xf32>
    %c5 = arith.constant 5 : index
    %c0_23 = arith.constant 0 : index
    %51 = vector.load %arg4[%c5, %c0_23] : memref<9x12xf32, #tpu.memory_space<vmem>>, vector<1x12xf32>
    %52 = vector.shape_cast %51 : vector<1x12xf32> to vector<12xf32>
    %53 = vector.shape_cast %52 : vector<12xf32> to vector<1x1x12xf32>
    %54 = vector.broadcast %53 : vector<1x1x12xf32> to vector<16x16x12xf32>
    %55 = arith.mulf %50, %54 : vector<16x16x12xf32>
    %56 = arith.addf %49, %55 : vector<16x16x12xf32>
    %57 = vector.extract_strided_slice %13 {offsets = [2, 7, 0], sizes = [16, 16, 12], strides = [1, 1, 1]} : vector<18x32x12xf32> to vector<16x16x12xf32>
    %c6 = arith.constant 6 : index
    %c0_24 = arith.constant 0 : index
    %58 = vector.load %arg4[%c6, %c0_24] : memref<9x12xf32, #tpu.memory_space<vmem>>, vector<1x12xf32>
    %59 = vector.shape_cast %58 : vector<1x12xf32> to vector<12xf32>
    %60 = vector.shape_cast %59 : vector<12xf32> to vector<1x1x12xf32>
    %61 = vector.broadcast %60 : vector<1x1x12xf32> to vector<16x16x12xf32>
    %62 = arith.mulf %57, %61 : vector<16x16x12xf32>
    %63 = arith.addf %56, %62 : vector<16x16x12xf32>
    %64 = vector.extract_strided_slice %13 {offsets = [2, 8, 0], sizes = [16, 16, 12], strides = [1, 1, 1]} : vector<18x32x12xf32> to vector<16x16x12xf32>
    %c7 = arith.constant 7 : index
    %c0_25 = arith.constant 0 : index
    %65 = vector.load %arg4[%c7, %c0_25] : memref<9x12xf32, #tpu.memory_space<vmem>>, vector<1x12xf32>
    %66 = vector.shape_cast %65 : vector<1x12xf32> to vector<12xf32>
    %67 = vector.shape_cast %66 : vector<12xf32> to vector<1x1x12xf32>
    %68 = vector.broadcast %67 : vector<1x1x12xf32> to vector<16x16x12xf32>
    %69 = arith.mulf %64, %68 : vector<16x16x12xf32>
    %70 = arith.addf %63, %69 : vector<16x16x12xf32>
    %71 = vector.extract_strided_slice %13 {offsets = [2, 9, 0], sizes = [16, 16, 12], strides = [1, 1, 1]} : vector<18x32x12xf32> to vector<16x16x12xf32>
    %c8_26 = arith.constant 8 : index
    %c0_27 = arith.constant 0 : index
    %72 = vector.load %arg4[%c8_26, %c0_27] : memref<9x12xf32, #tpu.memory_space<vmem>>, vector<1x12xf32>
    %73 = vector.shape_cast %72 : vector<1x12xf32> to vector<12xf32>
    %74 = vector.shape_cast %73 : vector<12xf32> to vector<1x1x12xf32>
    %75 = vector.broadcast %74 : vector<1x1x12xf32> to vector<16x16x12xf32>
    %76 = arith.mulf %71, %75 : vector<16x16x12xf32>
    %77 = arith.addf %70, %76 : vector<16x16x12xf32>
    %c0_28 = arith.constant 0 : index
    %c0_29 = arith.constant 0 : index
    %78 = vector.load %arg5[%c0_28, %c0_29] : memref<1x12xf32, #tpu.memory_space<vmem>>, vector<1x12xf32>
    %79 = vector.shape_cast %78 : vector<1x12xf32> to vector<12xf32>
    %80 = vector.shape_cast %79 : vector<12xf32> to vector<1x1x12xf32>
    %81 = vector.broadcast %80 : vector<1x1x12xf32> to vector<16x16x12xf32>
    %82 = arith.addf %77, %81 : vector<16x16x12xf32>
    %cst_30 = arith.constant 0.000000e+00 : f32
    %83 = vector.broadcast %cst_30 : f32 to vector<16x16x12xf32>
    %84 = arith.maximumf %82, %83 : vector<16x16x12xf32>
    %85 = vector.shape_cast %84 : vector<16x16x12xf32> to vector<256x12xf32>
    %c0_31 = arith.constant 0 : index
    %c0_32 = arith.constant 0 : index
    %86 = vector.load %arg6[%c0_31, %c0_32] : memref<12x16xf32, #tpu.memory_space<vmem>>, vector<12x16xf32>
    %cst_33 = arith.constant dense<0.000000e+00> : vector<256x16xf32>
    %87 = tpu.matmul %85, %86, %cst_33 {dimension_numbers = #tpu.dot_dimension_numbers<[1], [0], [0], [1], [0, 0, 1, 1], [], []>} : vector<256x12xf32>, vector<12x16xf32>, vector<256x16xf32> -> vector<256x16xf32>
    %c0_34 = arith.constant 0 : index
    %c0_35 = arith.constant 0 : index
    %c0_36 = arith.constant 0 : index
    %88 = vector.load %arg7[%c0_34, %c0_35, %c0_36] : memref<1x256x16xf32, #tpu.memory_space<vmem>>, vector<1x256x16xf32>
    %89 = vector.shape_cast %88 : vector<1x256x16xf32> to vector<256x16xf32>
    %90 = vector.shape_cast %87 : vector<256x16xf32> to vector<1x256x16xf32>
    tpu.vector_store %arg7[%c0_34, %c0_35, %c0_36], %90 {strides = array<i32>} : memref<1x256x16xf32, #tpu.memory_space<vmem>>, vector<1x256x16xf32>,
    return
  }
  func.func @transform_0(%arg0: i32) -> (i32, i32, i32) {
    %c0_i32 = arith.constant 0 : i32
    %c0_i32_0 = arith.constant 0 : i32
    %c0_i32_1 = arith.constant 0 : i32
    return %arg0, %c0_i32, %c0_i32_0 : i32, i32, i32
  }
  func.func @transform_1(%arg0: i32) -> (i32, i32) {
    %c0_i32 = arith.constant 0 : i32
    %c0_i32_0 = arith.constant 0 : i32
    %c0_i32_1 = arith.constant 0 : i32
    return %c0_i32, %c0_i32_0 : i32, i32
  }
  func.func @transform_2(%arg0: i32) -> (i32, i32) {
    %c0_i32 = arith.constant 0 : i32
    %c0_i32_0 = arith.constant 0 : i32
    %c0_i32_1 = arith.constant 0 : i32
    return %c0_i32, %c0_i32_0 : i32, i32
  }
  func.func @transform_3(%arg0: i32) -> (i32, i32) {
    %c0_i32 = arith.constant 0 : i32
    %c0_i32_0 = arith.constant 0 : i32
    %c0_i32_1 = arith.constant 0 : i32
    return %c0_i32, %c0_i32_0 : i32, i32
  }
  func.func @transform_4(%arg0: i32) -> (i32, i32) {
    %c0_i32 = arith.constant 0 : i32
    %c0_i32_0 = arith.constant 0 : i32
    %c0_i32_1 = arith.constant 0 : i32
    return %c0_i32, %c0_i32_0 : i32, i32
  }
  func.func @transform_5(%arg0: i32) -> (i32, i32) {
    %c0_i32 = arith.constant 0 : i32
    %c0_i32_0 = arith.constant 0 : i32
    %c0_i32_1 = arith.constant 0 : i32
    return %c0_i32, %c0_i32_0 : i32, i32
  }
  func.func @transform_6(%arg0: i32) -> (i32, i32, i32) {
    %c0_i32 = arith.constant 0 : i32
    %c0_i32_0 = arith.constant 0 : i32
    %c0_i32_1 = arith.constant 0 : i32
    return %arg0, %c0_i32, %c0_i32_0 : i32, i32, i32
  }
}

module attributes {stable_mosaic.version = 11 : i64} {
  func.func @_combine_kernel(%arg0: i32, %arg1: memref<1x16x256xf32, #tpu.memory_space<vmem>>, %arg2: memref<1x8x128xf32, #tpu.memory_space<vmem>>, %arg3: memref<16x8xf32, #tpu.memory_space<vmem>>, %arg4: memref<128x256xf32, #tpu.memory_space<vmem>>, %arg5: memref<1x256xf32, #tpu.memory_space<vmem>>, %arg6: memref<1x16x256xf32, #tpu.memory_space<vmem>>) attributes {dimension_semantics = [#tpu.dimension_semantics<parallel>], iteration_bounds = array<i64: 2>, scalar_prefetch = 0 : i64, scratch_operands = 0 : i64, tpu.core_type = #tpu.core_type<tc>, window_params = [{transform_indices = @transform_0, window_bounds = array<i64: 1, 16, 256>}, {transform_indices = @transform_1, window_bounds = array<i64: 1, 8, 128>}, {pipeline_mode = #tpu.pipeline_mode<synchronous>, transform_indices = @transform_2, window_bounds = array<i64: 16, 8>}, {pipeline_mode = #tpu.pipeline_mode<synchronous>, transform_indices = @transform_3, window_bounds = array<i64: 128, 256>}, {pipeline_mode = #tpu.pipeline_mode<synchronous>, transform_indices = @transform_4, window_bounds = array<i64: 1, 256>}, {transform_indices = @transform_5, window_bounds = array<i64: 1, 16, 256>}]} {
    %c0 = arith.constant 0 : index
    %c0_0 = arith.constant 0 : index
    %0 = vector.load %arg3[%c0, %c0_0] : memref<16x8xf32, #tpu.memory_space<vmem>>, vector<16x8xf32>
    %c0_1 = arith.constant 0 : index
    %c0_2 = arith.constant 0 : index
    %c0_3 = arith.constant 0 : index
    %1 = vector.load %arg2[%c0_1, %c0_2, %c0_3] : memref<1x8x128xf32, #tpu.memory_space<vmem>>, vector<1x8x128xf32>
    %2 = vector.shape_cast %1 : vector<1x8x128xf32> to vector<8x128xf32>
    %cst = arith.constant dense<0.000000e+00> : vector<16x128xf32>
    %3 = tpu.matmul %0, %2, %cst {dimension_numbers = #tpu.dot_dimension_numbers<[1], [0], [0], [1], [0, 0, 1, 1], [], []>} : vector<16x8xf32>, vector<8x128xf32>, vector<16x128xf32> -> vector<16x128xf32>
    %c0_4 = arith.constant 0 : index
    %c0_5 = arith.constant 0 : index
    %4 = vector.load %arg4[%c0_4, %c0_5] : memref<128x256xf32, #tpu.memory_space<vmem>>, vector<128x256xf32>
    %cst_6 = arith.constant dense<0.000000e+00> : vector<16x256xf32>
    %5 = tpu.matmul %3, %4, %cst_6 {dimension_numbers = #tpu.dot_dimension_numbers<[1], [0], [0], [1], [0, 0, 1, 1], [], []>} : vector<16x128xf32>, vector<128x256xf32>, vector<16x256xf32> -> vector<16x256xf32>
    %c0_7 = arith.constant 0 : index
    %c0_8 = arith.constant 0 : index
    %c0_9 = arith.constant 0 : index
    %6 = vector.load %arg1[%c0_7, %c0_8, %c0_9] : memref<1x16x256xf32, #tpu.memory_space<vmem>>, vector<1x16x256xf32>
    %7 = vector.shape_cast %6 : vector<1x16x256xf32> to vector<16x256xf32>
    %8 = arith.addf %7, %5 : vector<16x256xf32>
    %c0_10 = arith.constant 0 : index
    %c0_11 = arith.constant 0 : index
    %9 = vector.load %arg5[%c0_10, %c0_11] : memref<1x256xf32, #tpu.memory_space<vmem>>, vector<1x256xf32>
    %10 = vector.broadcast %9 : vector<1x256xf32> to vector<16x256xf32>
    %11 = arith.addf %8, %10 : vector<16x256xf32>
    %c0_12 = arith.constant 0 : index
    %c0_13 = arith.constant 0 : index
    %c0_14 = arith.constant 0 : index
    %12 = vector.load %arg6[%c0_12, %c0_13, %c0_14] : memref<1x16x256xf32, #tpu.memory_space<vmem>>, vector<1x16x256xf32>
    %13 = vector.shape_cast %12 : vector<1x16x256xf32> to vector<16x256xf32>
    %14 = vector.shape_cast %11 : vector<16x256xf32> to vector<1x16x256xf32>
    tpu.vector_store %arg6[%c0_12, %c0_13, %c0_14], %14 {strides = array<i32>} : memref<1x16x256xf32, #tpu.memory_space<vmem>>, vector<1x16x256xf32>,
    return
  }
  func.func @transform_0(%arg0: i32) -> (i32, i32, i32) {
    %c0_i32 = arith.constant 0 : i32
    %c0_i32_0 = arith.constant 0 : i32
    %c0_i32_1 = arith.constant 0 : i32
    return %arg0, %c0_i32, %c0_i32_0 : i32, i32, i32
  }
  func.func @transform_1(%arg0: i32) -> (i32, i32, i32) {
    %c0_i32 = arith.constant 0 : i32
    %c0_i32_0 = arith.constant 0 : i32
    %c0_i32_1 = arith.constant 0 : i32
    return %arg0, %c0_i32, %c0_i32_0 : i32, i32, i32
  }
  func.func @transform_2(%arg0: i32) -> (i32, i32) {
    %c0_i32 = arith.constant 0 : i32
    %c0_i32_0 = arith.constant 0 : i32
    %c0_i32_1 = arith.constant 0 : i32
    return %c0_i32, %c0_i32_0 : i32, i32
  }
  func.func @transform_3(%arg0: i32) -> (i32, i32) {
    %c0_i32 = arith.constant 0 : i32
    %c0_i32_0 = arith.constant 0 : i32
    %c0_i32_1 = arith.constant 0 : i32
    return %c0_i32, %c0_i32_0 : i32, i32
  }
  func.func @transform_4(%arg0: i32) -> (i32, i32) {
    %c0_i32 = arith.constant 0 : i32
    %c0_i32_0 = arith.constant 0 : i32
    %c0_i32_1 = arith.constant 0 : i32
    return %c0_i32, %c0_i32_0 : i32, i32
  }
  func.func @transform_5(%arg0: i32) -> (i32, i32, i32) {
    %c0_i32 = arith.constant 0 : i32
    %c0_i32_0 = arith.constant 0 : i32
    %c0_i32_1 = arith.constant 0 : i32
    return %arg0, %c0_i32, %c0_i32_0 : i32, i32, i32
  }
}

</mosaic_0001>

<bundles_post_ra>
// kernel: tile.8
= control target key start
LH: loop header
LB: loop body
LE: loop exit
PB: predicated region body
PF: predicated region fallthrough
CT: control target
= control target key end

     0   :  { %s28_s0 = inlined_call_operand.vmem [shape: f32[16], index: 0, kind: input, shape index: {}]   ;;  %s29_s1 = inlined_call_operand.vmem [shape: f32[16,16], index: 1, kind: output, shape index: {}]  }
   0x1   :  { %v4_v0 = vld [vmem:[%s28_s0] ss:$0 sm:$0xff] }
   0x2   :  { %5 = vst [vmem:[%s29_s1] sm:$0xff] %v4_v0  ;;  %8 = vst [vmem:[%s29_s1 + $0x8] sm:$0xff] %v4_v0 }

// kernel: tile.9
= control target key start
LH: loop header
LB: loop body
LE: loop exit
PB: predicated region body
PF: predicated region fallthrough
CT: control target
= control target key end

     0   :  { %s7_s6 = smov 3  ;;  %s21_s9 = smov 3  ;;  %vm4_vm0 = vcmask 130048   ;;  %vm11_vm1 = vcmask 1048448   ;;  %vm18_vm2 = vcmask 917248   ;;  %vm25_vm3 = vcmask 786048   ;;  %s128_s0 = inlined_call_operand.vmem [shape: f32[16,16], index: 0, kind: input, shape index: {}]   ;;  %s129_s1 = inlined_call_operand.vmem [shape: f32[1,256], index: 1, kind: output, shape index: {}]  }
   0x1   :  { %v66_v0 = vld [vmem:[%s128_s0 + $0x7] ss:$8 sm:%s7_s6]   ;;  %s81_s10 = smov 112   ;;  %v68_v1 = vld [vmem:[%s128_s0 + $0x5] ss:$8 sm:%s21_s9]   ;;  %s14_s13 = smov 3 }
   0x2   :  { %9 = vrot.lane.b32.xlu0 %v66_v0, %s81_s10  ;;  %s82_s14 = smov 80   ;;  %v67_v2 = vld [vmem:[%s128_s0 + $0x6] ss:$8 sm:%s14_s13]   ;;  %s28_s17 = smov 3  ;;  %vm32_vm4 = vcmask 654848   ;;  %vm39_vm5 = vcmask 523648  }
   0x3   :  { %23 = vrot.lane.b32.xlu1 %v68_v1, %s82_s14  ;;  %v69_v3 = vld [vmem:[%s128_s0 + $0x4] ss:$8 sm:%s28_s17]   ;;  %s35_s20 = smov 3  ;;  %s42_s21 = smov 3  ;;  %vm46_vm6 = vcmask 392448   ;;  %vm53_vm7 = vcmask 261248  }
   0x4   :  { %s83_s22 = smov 96   ;;  %s84_s23 = smov 64   ;;  %v70_v4 = vld [vmem:[%s128_s0 + $0x3] ss:$8 sm:%s35_s20]   ;;  %v71_v5 = vld [vmem:[%s128_s0 + $0x2] ss:$8 sm:%s42_s21]  }
   0x5   :  { %s2_s26 = smov 3  ;;  %s49_s29 = smov 3 }
   0x6   :  { %16 = vrot.lane.b32.xlu0 %v67_v2, %s83_s22  ;;  %v3_v6 = vld [vmem:[%s128_s0] ss:$8 sm:%s2_s26]   ;;  %s85_s3 = smov 48   ;;  %s86_s4 = smov 32  }
   0x7   :  { %30 = vrot.lane.b32.xlu1 %v69_v3, %s84_s23  ;;  %5 = vst.msk [vmem:[#allocation0] ss:$8 sm:$0x3] %vm4_vm0, %v3_v6   ;;  %v72_v7 = vld [vmem:[%s128_s0 + $0x1] ss:$8 sm:%s49_s29]   ;;  %s87_s0 = smov 16  }
   0xa   :  { %37 = vrot.lane.b32.xlu0 %v70_v4, %s85_s3 }
   0xb   :  { %44 = vrot.lane.b32.xlu1 %v71_v5, %s86_s4 }
   0xe   :  { %51 = vrot.lane.b32.xlu0 %v72_v7, %s87_s0 }
  0x74   :  { %v10_v8 = vpop.permute.xlu0 %9  }
  0x75   :  { %12 = vst.msk [vmem:[#allocation0] ss:$8 sm:$0x3] %vm11_vm1, %v10_v8   ;;  %v24_v9 = vpop.permute.xlu1 %23  }
  0x78   :  { %v17_v10 = vpop.permute.xlu0 %16  }
  0x79   :  { %19 = vst.msk [vmem:[#allocation0] ss:$8 sm:$0x3] %vm18_vm2, %v17_v10   ;;  %v31_v11 = vpop.permute.xlu1 %30  }
  0x7a   :  { %26 = vst.msk [vmem:[#allocation0] ss:$8 sm:$0x3] %vm25_vm3, %v24_v9  }
  0x7b   :  { %33 = vst.msk [vmem:[#allocation0] ss:$8 sm:$0x3] %vm32_vm4, %v31_v11  }
  0x7c   :  { %v38_v12 = vpop.permute.xlu0 %37  }
  0x7d   :  { %40 = vst.msk [vmem:[#allocation0] ss:$8 sm:$0x3] %vm39_vm5, %v38_v12   ;;  %v45_v13 = vpop.permute.xlu1 %44  }
  0x7e   :  { %47 = vst.msk [vmem:[#allocation0] ss:$8 sm:$0x3] %vm46_vm6, %v45_v13  }
  0x80   :  { %v52_v14 = vpop.permute.xlu0 %51  }
  0x81   :  { %54 = vst.msk [vmem:[#allocation0] ss:$8 sm:$0x3] %vm53_vm7, %v52_v14  }
  0x88   :  { %v58_v15 = vld [vmem:[#allocation0] sm:$0x1]  ;;  %v62_v16 = vld [vmem:[#allocation0 + $0x8] sm:$0x1] }
  0x89   :  { %60 = vst [vmem:[%s129_s1] sm:$0x1] %v58_v15  ;;  %73 = vst [vmem:[%s129_s1 + $0x1] sm:$0x1] %v62_v16 }

</bundles_post_ra>
